<compile_context>
chip_gen: v5e
topology: v5e:2x2
jax: 0.10.0
libtpu: 0.0.40
codegen_flags: <defaults>
</compile_context>

<pallas_src>
import functools

import jax
import jax.numpy as jnp
from jax.experimental import pallas as pl
from jax.experimental.pallas import tpu as pltpu


def _round_up(x, m):
    return ((x + m - 1) // m) * m


# ---------------------------------------------------------------------------
# Kernel
# ---------------------------------------------------------------------------
def autoencoder_kernel(x_ref, w1t_ref, b1_ref, w2t_ref, b2_ref, enc_ref, dec_ref):
    """One batch tile: enc = relu(x @ W1t + b1); dec = sigmoid(enc @ W2t + b2)."""
    md = w1t_ref.dtype
    # In-kernel cast of x to the matmul dtype (bf16 path): VPU work hidden
    # under the DMA, avoids a wrapper-side extra HBM pass over x.
    x = x_ref[...].astype(md)                                   # (TB, D_in)

    # Encoder: MXU matmul, f32 accumulate, f32 epilogue.
    h = jnp.dot(x, w1t_ref[...], preferred_element_type=jnp.float32) + b1_ref[...]
    enc = jnp.maximum(h, 0.0)                                   # (TB, D_enc_pad) f32

    # Store only the true encoding columns (narrow masked store is far cheaper
    # than DMAing 128 padded lanes per row back to HBM).
    d_enc = enc_ref.shape[-1]
    enc_ref[...] = enc[:, :d_enc].astype(enc_ref.dtype)

    # Decoder: sigmoid(d) = 0.5 * (tanh(d / 2) + 1) -> single EUP op.
    d = jnp.dot(enc.astype(md), w2t_ref[...],
                preferred_element_type=jnp.float32) + b2_ref[...]
    dec_ref[...] = (0.5 * (jnp.tanh(0.5 * d) + 1.0)).astype(dec_ref.dtype)


# ---------------------------------------------------------------------------
# Parameter prep (outside the hot path)
# ---------------------------------------------------------------------------
def prepare_params(w1, b1, w2, b2, matmul_dtype=jnp.float32):
    """PyTorch Linear weights are (out, in); transpose once and zero-pad the
    encoding dim to a multiple of 128 so the MXU operands / intermediate are
    lane-dense.  Biases stay f32 (the epilogue runs in f32 everywhere)."""
    d_enc, d_in = w1.shape
    d_enc_pad = _round_up(max(d_enc, 128), 128)

    w1t = jnp.zeros((d_in, d_enc_pad), matmul_dtype).at[:, :d_enc].set(
        w1.T.astype(matmul_dtype))
    b1r = jnp.zeros((1, d_enc_pad), jnp.float32).at[:, :d_enc].set(
        b1.astype(jnp.float32))
    w2t = jnp.zeros((d_enc_pad, d_in), matmul_dtype).at[:d_enc, :].set(
        w2.T.astype(matmul_dtype))
    b2r = b2.reshape(1, d_in).astype(jnp.float32)
    return w1t, b1r, w2t, b2r


# ---------------------------------------------------------------------------
# Tile / VMEM sizing
# ---------------------------------------------------------------------------
def _tile_vmem_bytes(tb, d_in, d_enc, d_enc_pad, w_itemsize):
    # Double-buffered streamed blocks (x f32 in, enc/dec f32 out) +
    # (conservatively double-counted) resident weights/biases.
    io = 2 * tb * d_in * 4 + 2 * tb * d_enc * 4 + 2 * tb * d_in * 4
    w = 2 * (2 * d_in * d_enc_pad * w_itemsize + (d_enc_pad + d_in) * 4)
    # Intermediates at padded width (enc value, dot results) live in VMEM too.
    tmp = 3 * tb * d_enc_pad * 4
    return io + w + tmp


def _vmem_budget_and_limit():
    """Generation-aware VMEM budget / limit (v7x: 64 MiB per TC; v5e/v6e: 128 MiB)."""
    try:
        cap = int(pltpu.get_tpu_info().vmem_capacity_bytes)
    except Exception:
        cap = 64 << 20  # conservative fallback (v7x-safe)
    if cap <= (64 << 20):
        return 24 << 20, 40 << 20      # budget, vmem_limit cap (v7x)
    return 64 << 20, 96 << 20          # v5e / v6e


def _choose_block_batch(batch, d_in, d_enc, d_enc_pad, w_itemsize, budget):
    # Bytes-based target: ~4 MiB of x per grid step to amortize the ~0.35 us
    # per-step overhead (no hard row cap).
    target_rows = max(256, (4 << 20) // max(1, d_in * 4))
    tb = _round_up(min(target_rows, batch), 8)
    # Guarantee >=2 grid steps so "parallel" shards across both v7x TCs.
    if batch >= 16:
        tb = min(tb, _round_up((batch + 1) // 2, 8))
    # Shrink (in multiples of 8) until the tile fits the VMEM budget.
    while tb > 8 and _tile_vmem_bytes(tb, d_in, d_enc, d_enc_pad, w_itemsize) > budget:
        tb -= 8
    return max(tb, 8)


# ---------------------------------------------------------------------------
# Forward wrapper
# ---------------------------------------------------------------------------
@functools.partial(jax.jit, static_argnames=("encoding_dim", "block_batch"))
def autoencoder_forward(x, w1t, b1r, w2t, b2r, *, encoding_dim, block_batch=None):
    """x: (B, D_in) f32. Params from prepare_params. Returns (enc, dec) f32."""
    B, D_in = x.shape
    D_enc_pad = w1t.shape[1]
    w_itemsize = jnp.dtype(w1t.dtype).itemsize

    budget, limit_cap = _vmem_budget_and_limit()
    if block_batch is None:
        TB = _choose_block_batch(B, D_in, encoding_dim, D_enc_pad, w_itemsize, budget)
    else:
        TB = max(8, _round_up(block_batch, 8))

    grid = (pl.cdiv(B, TB),)
    tile_bytes = _tile_vmem_bytes(TB, D_in, encoding_dim, D_enc_pad, w_itemsize)
    vmem_limit = int(min(limit_cap, max(16 << 20, 2 * tile_bytes)))

    param_bytes = 2 * D_in * D_enc_pad * w_itemsize + (D_enc_pad + D_in) * 4
    cost = pl.CostEstimate(
        flops=4 * B * D_in * D_enc_pad,                 # two matmuls
        transcendentals=B * D_in,                       # tanh in the sigmoid
        bytes_accessed=B * D_in * 4                     # x read
        + B * encoding_dim * 4 + B * D_in * 4           # enc + dec writes
        + param_bytes,
    )

    enc, dec = pl.pallas_call(
        autoencoder_kernel,
        out_shape=(
            jax.ShapeDtypeStruct((B, encoding_dim), jnp.float32),
            jax.ShapeDtypeStruct((B, D_in), jnp.float32),
        ),
        grid=grid,
        in_specs=[
            pl.BlockSpec((TB, D_in), lambda i: (i, 0)),          # x: batch-tiled (f32)
            pl.BlockSpec((D_in, D_enc_pad), lambda i: (0, 0)),   # W1t: resident
            pl.BlockSpec((1, D_enc_pad), lambda i: (0, 0)),      # b1: resident
            pl.BlockSpec((D_enc_pad, D_in), lambda i: (0, 0)),   # W2t: resident
            pl.BlockSpec((1, D_in), lambda i: (0, 0)),           # b2: resident
        ],
        out_specs=(
            pl.BlockSpec((TB, encoding_dim), lambda i: (i, 0)),  # true-width enc
            pl.BlockSpec((TB, D_in), lambda i: (i, 0)),
        ),
        compiler_params=pltpu.CompilerParams(
            dimension_semantics=("parallel",),
            vmem_limit_bytes=vmem_limit,
        ),
        cost_estimate=cost,
    )(x, w1t, b1r, w2t, b2r)

    return enc, dec


# ---------------------------------------------------------------------------
# Deterministic init mimicking PyTorch Linear defaults
# ---------------------------------------------------------------------------
def init_params(key, input_dim, encoding_dim):
    k1, k2, k3, k4 = jax.random.split(key, 4)
    lim1 = 1.0 / jnp.sqrt(input_dim)
    lim2 = 1.0 / jnp.sqrt(encoding_dim)
    w1 = jax.random.uniform(k1, (encoding_dim, input_dim), jnp.float32, -lim1, lim1)
    b1 = jax.random.uniform(k2, (encoding_dim,), jnp.float32, -lim1, lim1)
    w2 = jax.random.uniform(k3, (input_dim, encoding_dim), jnp.float32, -lim2, lim2)
    b2 = jax.random.uniform(k4, (input_dim,), jnp.float32, -lim2, lim2)
    return w1, b1, w2, b2


if __name__ == "__main__":
    batch = 50            # deliberately NOT a multiple of the batch tile
    input_dim = 32
    encoding_dim = 2

    key = jax.random.PRNGKey(0)
    kx, kp = jax.random.split(key)
    x = jax.random.normal(kx, (batch, input_dim), jnp.float32)
    w1, b1, w2, b2 = init_params(kp, input_dim, encoding_dim)

    # Pure-JAX reference.
    enc_ref = jnp.maximum(x @ w1.T + b1, 0.0)
    dec_ref = jax.nn.sigmoid(enc_ref @ w2.T + b2)

    # ---- f32 matmul path, auto tile (>=2 grid steps, partial last block) ----
    params_f32 = prepare_params(w1, b1, w2, b2, matmul_dtype=jnp.float32)
    enc, dec = autoencoder_forward(x, *params_f32, encoding_dim=encoding_dim)
    jax.block_until_ready((enc, dec))
    assert enc.shape == (batch, encoding_dim) and dec.shape == (batch, input_dim)
    assert jnp.allclose(enc, enc_ref, atol=1e-5), "encoder mismatch (f32)"
    assert jnp.allclose(dec, dec_ref, atol=1e-5), "decoder mismatch (f32)"

    # ---- f32 path with a small explicit tile (exercises a 4-step grid) ----
    enc_s, dec_s = autoencoder_forward(x, *params_f32, encoding_dim=encoding_dim,
                                       block_batch=16)
    jax.block_until_ready((enc_s, dec_s))
    assert jnp.allclose(enc_s, enc_ref, atol=1e-5), "encoder mismatch (f32, tb=16)"
    assert jnp.allclose(dec_s, dec_ref, atol=1e-5), "decoder mismatch (f32, tb=16)"

    # ---- bf16 matmul path (weights bf16, x cast in-kernel), looser tolerance ----
    params_bf16 = prepare_params(w1, b1, w2, b2, matmul_dtype=jnp.bfloat16)
    enc_b, dec_b = autoencoder_forward(x, *params_bf16, encoding_dim=encoding_dim)
    jax.block_until_ready((enc_b, dec_b))
    assert jnp.allclose(enc_b, enc_ref, atol=5e-2, rtol=2e-2), "encoder mismatch (bf16)"
    assert jnp.allclose(dec_b, dec_ref, atol=5e-2, rtol=2e-2), "decoder mismatch (bf16)"

    print("KERNEL_OK")
</pallas_src>

<mosaic_0001>
module attributes {stable_mosaic.version = 11 : i64} {
  func.func @autoencoder_kernel(%arg0: i32, %arg1: memref<32x32xf32, #tpu.memory_space<vmem>>, %arg2: memref<32x128xf32, #tpu.memory_space<vmem>>, %arg3: memref<1x128xf32, #tpu.memory_space<vmem>>, %arg4: memref<128x32xf32, #tpu.memory_space<vmem>>, %arg5: memref<1x32xf32, #tpu.memory_space<vmem>>, %arg6: memref<32x2xf32, #tpu.memory_space<vmem>>, %arg7: memref<32x32xf32, #tpu.memory_space<vmem>>) attributes {dimension_semantics = [#tpu.dimension_semantics<parallel>], iteration_bounds = array<i64: 2>, scalar_prefetch = 0 : i64, scratch_operands = 0 : i64, tpu.core_type = #tpu.core_type<tc>, window_params = [{transform_indices = @transform_0, window_bounds = array<i64: 32, 32>}, {pipeline_mode = #tpu.pipeline_mode<synchronous>, transform_indices = @transform_1, window_bounds = array<i64: 32, 128>}, {pipeline_mode = #tpu.pipeline_mode<synchronous>, transform_indices = @transform_2, window_bounds = array<i64: 1, 128>}, {pipeline_mode = #tpu.pipeline_mode<synchronous>, transform_indices = @transform_3, window_bounds = array<i64: 128, 32>}, {pipeline_mode = #tpu.pipeline_mode<synchronous>, transform_indices = @transform_4, window_bounds = array<i64: 1, 32>}, {transform_indices = @transform_5, window_bounds = array<i64: 32, 2>}, {transform_indices = @transform_6, window_bounds = array<i64: 32, 32>}]} {
    %c0 = arith.constant 0 : index
    %c0_0 = arith.constant 0 : index
    %0 = vector.load %arg1[%c0, %c0_0] : memref<32x32xf32, #tpu.memory_space<vmem>>, vector<32x32xf32>
    %c0_1 = arith.constant 0 : index
    %c0_2 = arith.constant 0 : index
    %1 = vector.load %arg2[%c0_1, %c0_2] : memref<32x128xf32, #tpu.memory_space<vmem>>, vector<32x128xf32>
    %cst = arith.constant dense<0.000000e+00> : vector<32x128xf32>
    %2 = tpu.matmul %0, %1, %cst {dimension_numbers = #tpu.dot_dimension_numbers<[1], [0], [0], [1], [0, 0, 1, 1], [], []>} : vector<32x32xf32>, vector<32x128xf32>, vector<32x128xf32> -> vector<32x128xf32>
    %c0_3 = arith.constant 0 : index
    %c0_4 = arith.constant 0 : index
    %3 = vector.load %arg3[%c0_3, %c0_4] : memref<1x128xf32, #tpu.memory_space<vmem>>, vector<1x128xf32>
    %4 = vector.broadcast %3 : vector<1x128xf32> to vector<32x128xf32>
    %5 = arith.addf %2, %4 : vector<32x128xf32>
    %cst_5 = arith.constant 0.000000e+00 : f32
    %6 = vector.broadcast %cst_5 : f32 to vector<32x128xf32>
    %7 = arith.maximumf %5, %6 : vector<32x128xf32>
    %8 = vector.extract_strided_slice %7 {offsets = [0, 0], sizes = [32, 2], strides = [1, 1]} : vector<32x128xf32> to vector<32x2xf32>
    %c0_6 = arith.constant 0 : index
    %c0_7 = arith.constant 0 : index
    %9 = vector.load %arg6[%c0_6, %c0_7] : memref<32x2xf32, #tpu.memory_space<vmem>>, vector<32x2xf32>
    tpu.vector_store %arg6[%c0_6, %c0_7], %8 {strides = array<i32>} : memref<32x2xf32, #tpu.memory_space<vmem>>, vector<32x2xf32>,
    %c0_8 = arith.constant 0 : index
    %c0_9 = arith.constant 0 : index
    %10 = vector.load %arg4[%c0_8, %c0_9] : memref<128x32xf32, #tpu.memory_space<vmem>>, vector<128x32xf32>
    %cst_10 = arith.constant dense<0.000000e+00> : vector<32x32xf32>
    %11 = tpu.matmul %7, %10, %cst_10 {dimension_numbers = #tpu.dot_dimension_numbers<[1], [0], [0], [1], [0, 0, 1, 1], [], []>} : vector<32x128xf32>, vector<128x32xf32>, vector<32x32xf32> -> vector<32x32xf32>
    %c0_11 = arith.constant 0 : index
    %c0_12 = arith.constant 0 : index
    %12 = vector.load %arg5[%c0_11, %c0_12] : memref<1x32xf32, #tpu.memory_space<vmem>>, vector<1x32xf32>
    %13 = vector.broadcast %12 : vector<1x32xf32> to vector<32x32xf32>
    %14 = arith.addf %11, %13 : vector<32x32xf32>
    %cst_13 = arith.constant 5.000000e-01 : f32
    %15 = vector.broadcast %cst_13 : f32 to vector<32x32xf32>
    %16 = arith.mulf %15, %14 : vector<32x32xf32>
    %17 = math.tanh %16 : vector<32x32xf32>
    %cst_14 = arith.constant 1.000000e+00 : f32
    %18 = vector.broadcast %cst_14 : f32 to vector<32x32xf32>
    %19 = arith.addf %17, %18 : vector<32x32xf32>
    %cst_15 = arith.constant 5.000000e-01 : f32
    %20 = vector.broadcast %cst_15 : f32 to vector<32x32xf32>
    %21 = arith.mulf %20, %19 : vector<32x32xf32>
    %c0_16 = arith.constant 0 : index
    %c0_17 = arith.constant 0 : index
    %22 = vector.load %arg7[%c0_16, %c0_17] : memref<32x32xf32, #tpu.memory_space<vmem>>, vector<32x32xf32>
    tpu.vector_store %arg7[%c0_16, %c0_17], %21 {strides = array<i32>} : memref<32x32xf32, #tpu.memory_space<vmem>>, vector<32x32xf32>,
    return
  }
  func.func @transform_0(%arg0: i32) -> (i32, i32) {
    %c0_i32 = arith.constant 0 : i32
    %c0_i32_0 = arith.constant 0 : i32
    return %arg0, %c0_i32 : i32, i32
  }
  func.func @transform_1(%arg0: i32) -> (i32, i32) {
    %c0_i32 = arith.constant 0 : i32
    %c0_i32_0 = arith.constant 0 : i32
    %c0_i32_1 = arith.constant 0 : i32
    return %c0_i32, %c0_i32_0 : i32, i32
  }
  func.func @transform_2(%arg0: i32) -> (i32, i32) {
    %c0_i32 = arith.constant 0 : i32
    %c0_i32_0 = arith.constant 0 : i32
    %c0_i32_1 = arith.constant 0 : i32
    return %c0_i32, %c0_i32_0 : i32, i32
  }
  func.func @transform_3(%arg0: i32) -> (i32, i32) {
    %c0_i32 = arith.constant 0 : i32
    %c0_i32_0 = arith.constant 0 : i32
    %c0_i32_1 = arith.constant 0 : i32
    return %c0_i32, %c0_i32_0 : i32, i32
  }
  func.func @transform_4(%arg0: i32) -> (i32, i32) {
    %c0_i32 = arith.constant 0 : i32
    %c0_i32_0 = arith.constant 0 : i32
    %c0_i32_1 = arith.constant 0 : i32
    return %c0_i32, %c0_i32_0 : i32, i32
  }
  func.func @transform_5(%arg0: i32) -> (i32, i32) {
    %c0_i32 = arith.constant 0 : i32
    %c0_i32_0 = arith.constant 0 : i32
    return %arg0, %c0_i32 : i32, i32
  }
  func.func @transform_6(%arg0: i32) -> (i32, i32) {
    %c0_i32 = arith.constant 0 : i32
    %c0_i32_0 = arith.constant 0 : i32
    return %arg0, %c0_i32 : i32, i32
  }
}

</mosaic_0001>

<bundles_post_ra>
// kernel: autoencoder_forward.1
= control target key start
LH: loop header
LB: loop body
LE: loop exit
PB: predicated region body
PF: predicated region fallthrough
CT: control target
= control target key end

     0   :  { %s1281_s21 = smov 0   ;;  %s1283_s22 = smov 0   ;;  %s1521_s0 = inlined_call_operand.vmem [shape: f32[50,32], index: 0, kind: input, shape index: {}]   ;;  %s1522_s1 = inlined_call_operand.vmem [shape: f32[32,128], index: 1, kind: input, shape index: {}]   ;;  %s1523_s2 = inlined_call_operand.vmem [shape: f32[1,128], index: 2, kind: input, shape index: {}]   ;;  %s1524_s3 = inlined_call_operand.vmem [shape: f32[128,32], index: 3, kind: input, shape index: {}]   ;;  %s1525_s4 = inlined_call_operand.vmem [shape: f32[1,32], index: 4, kind: input, shape index: {}]   ;;  %s1526_s5 = inlined_call_operand.vmem [shape: f32[50,2], index: 5, kind: output, shape index: {0}]   ;;  %s1527_s6 = inlined_call_operand.vmem [shape: f32[50,32], index: 6, kind: output, shape index: {1}]  }
   0x1   :  { %s1285_s23 = smov 0  }
   0x2 LB: > { %s1294_s24 = sadd.s32 4294967295, %s1180_s23   ;;  %s1296_s25 = sadd.s32 1, %s1180_s23   ;;  %s1180_s23 = sphi %s1285_s23, %s1537_s23   ;;  %s1176_s22 = sphi %s1283_s22, %s1536_s22   ;;  %s1172_s21 = sphi %s1281_s21, %s1535_s21  }
   0x3   : > { %s131_s26 = ssub.s32 %s1180_s23, %s1296_s25  ;;  %s134_s27 = sadd.s32 1, %s1176_s22 }
   0x4   : > { %p132_p0 = scmp.eq.s32.totalorder %s131_s26, 0  ;;  %p144_p1 = scmp.ne.s32.totalorder %s1176_s22, %s1172_s21 }
   0x5   : > { %p145_p2 = scmp.eq.s32.totalorder %s1294_s24, 1  ;;  %p853_p3 = scmp.ge.s32.totalorder %s1180_s23, 1 }
   0x6   : > { %s1304_s28 = scalar_select %p132_p0, %s1176_s22, %s134_s27  }
   0x7   : > { %p1306_p4 = por %p145_p2, %p144_p1  ;;  %p224_p5 = scmp.lt.s32.totalorder %s1180_s23, 3 }
   0x9   : > { %p225_p6 = pnand %p853_p3, %p224_p5 }
   0xa   : > { %s1317_s10 = sshll.u32 (!%p225_p6), %s1294_s24, 2 }
   0xb   : > { %228 = sbr.rel (%p225_p6) target bundleno = 409 (0x199), region = 40  ;;  %p266_p7 = scmp.lt.s32.totalorder (!%p225_p6), %s1317_s10, 6 }
  0x10   : > { %v292_v0 = vld [vmem:[%s1522_s1 + $0x18] sm:$0xff]  ;;  %v291_v1 = vld [vmem:[%s1522_s1 + $0x10] sm:$0xff]  ;;  %v290_v4 = vld [vmem:[%s1522_s1 + $0x8] sm:$0xff]  ;;  %s267_s17 = scalar_select %p266_p7, %s1317_s10, 6  ;;  %vm297_vm0 = vcmask 261120   ;;  %vm343_vm1 = vcmask 15360  }
  0x11   : > { %322 = vmatpush.msra.mxu0 %v292_v0  ;;  %v363_v2 = vld [vmem:[%s1524_s3 + $0x78] sm:$0xff]  ;;  %v362_v3 = vld [vmem:[%s1524_s3 + $0x70] sm:$0xff]  ;;  %v361_v5 = vld [vmem:[%s1524_s3 + $0x68] sm:$0xff]  ;;  %s429_s7 = ssub.s32 (%p1306_p4), 7, %s1317_s10  ;;  %s894_s8 = sshll.u32 (%p1306_p4), %s1294_s24, 5 }
  0x12   : > { %368 = vmatpush.msra.mxu1 %v363_v2  ;;  %900 = vmatpush.msra.mxu2 %v363_v2  ;;  %v289_v6 = vld [vmem:[%s1522_s1] sm:$0xff]  ;;  %s857_s26 = sshll.u32 %s267_s17, 3  ;;  %v359_v9 = vld [vmem:[%s1524_s3 + $0x58] sm:$0xff]  ;;  %v358_v10 = vld [vmem:[%s1524_s3 + $0x50] sm:$0xff]  ;;  %p430_p8 = scmp.lt.s32.totalorder (%p1306_p4), %s429_s7, 4 }
  0x13   : > { %323 = vmatpush.msra.mxu0 %v291_v1  ;;  %901 = vmatpush.msra.mxu3 %v363_v2  ;;  %v360_v7 = vld [vmem:[%s1524_s3 + $0x60] sm:$0xff]  ;;  %s1342_s9 = scalar_lea.vmem %s1521_s0, %s857_s26  ;;  %v357_v11 = vld [vmem:[%s1524_s3 + $0x48] sm:$0xff]  ;;  %v355_v14 = vld [vmem:[%s1524_s3 + $0x38] sm:$0xff]  ;;  %s1426_s13 = scalar_lea.vmem (%p1306_p4), %s1526_s5, %s894_s8  }
  0x14   : > { %369 = vmatpush.msra.mxu1 %v362_v3  ;;  %902 = vmatpush.msra.mxu2 %v362_v3  ;;  %v285_v8 = vld [vmem:[%s1342_s9] sm:$0xff]  ;;  %v286_v12 = vld [vmem:[%s1342_s9 + $0x8] sm:$0xff]  ;;  %v354_v15 = vld [vmem:[%s1524_s3 + $0x30] sm:$0xff] }
  0x15   : > { %324 = vmatpush.msra.mxu0 %v290_v4  ;;  %903 = vmatpush.msra.mxu3 %v362_v3  ;;  %v356_v13 = vld [vmem:[%s1524_s3 + $0x40] sm:$0xff]  ;;  %v353_v16 = vld [vmem:[%s1524_s3 + $0x28] sm:$0xff]  ;;  %v287_v17 = vld [vmem:[%s1342_s9 + $0x10] sm:$0xff] }
  0x16   : > { %370 = vmatpush.msra.mxu1 %v361_v5  ;;  %904 = vmatpush.msra.mxu2 %v361_v5  ;;  %v352_v18 = vld [vmem:[%s1524_s3 + $0x20] sm:$0xff]  ;;  %v351_v19 = vld [vmem:[%s1524_s3 + $0x18] sm:$0xff]  ;;  %v350_v21 = vld [vmem:[%s1524_s3 + $0x10] sm:$0xff] }
  0x17   : > { %325 = vmatpush.msra.mxu0 %v289_v6  ;;  %905 = vmatpush.msra.mxu3 %v361_v5  ;;  %v288_v20 = vld [vmem:[%s1342_s9 + $0x18] sm:$0xff]  ;;  %v349_v22 = vld [vmem:[%s1524_s3 + $0x8] sm:$0xff]  ;;  %v348_v23 = vld [vmem:[%s1524_s3] sm:$0xff]  ;;  %s252_s9 = sand.u32 1, %s1172_s21  }
  0x18   : > { %858 = vmatmul.msk.f32.vlgmr.msra.gmra.mxu0 %vm297_vm0, %v285_v8  ;;  %371 = vmatpush.msra.mxu1 %v360_v7  ;;  %v1084_v24 = vld [vmem:[%s1523_s2] ss:$0 sm:$0xff]  ;;  %s1392_s23 = sshll.u32 %s252_s9, 5 }
  0x19   : > { %906 = vmatpush.msra.mxu2 %v360_v7  ;;  %907 = vmatpush.msra.mxu3 %v360_v7  ;;  %s1395_s26 = scalar_lea.vmem [#allocation2], %s1392_s23   ;;  %v1085_v37 = vld [vmem:[%s1525_s4] ss:$0 sm:$0xff]  ;;  %s1409_s30 = scalar_lea.vmem [#allocation3], %s1392_s23  }
  0x1a   : > { %372 = vmatpush.msra.mxu1 %v359_v9 }
  0x1b   : > { %908 = vmatpush.msra.mxu2 %v359_v9  ;;  %909 = vmatpush.msra.mxu3 %v359_v9 }
  0x1c   : > { %373 = vmatpush.msra.mxu1 %v358_v10 }
  0x1d   : > { %910 = vmatpush.msra.mxu2 %v358_v10  ;;  %911 = vmatpush.msra.mxu3 %v358_v10 }
  0x1e   : > { %374 = vmatpush.msra.mxu1 %v357_v11 }
  0x1f   : > { %912 = vmatpush.msra.mxu2 %v357_v11  ;;  %913 = vmatpush.msra.mxu3 %v357_v11 }
  0x20   : > { %859 = vmatmul.msk.f32.gmra.mxu0 %vm297_vm0, %v286_v12  ;;  %375 = vmatpush.msra.mxu1 %v356_v13 }
  0x21   : > { %914 = vmatpush.msra.mxu2 %v356_v13  ;;  %915 = vmatpush.msra.mxu3 %v356_v13 }
  0x22   : > { %376 = vmatpush.msra.mxu1 %v355_v14 }
  0x23   : > { %916 = vmatpush.msra.mxu2 %v355_v14  ;;  %917 = vmatpush.msra.mxu3 %v355_v14 }
  0x24   : > { %377 = vmatpush.msra.mxu1 %v354_v15 }
  0x25   : > { %918 = vmatpush.msra.mxu2 %v354_v15  ;;  %919 = vmatpush.msra.mxu3 %v354_v15 }
  0x26   : > { %378 = vmatpush.msra.mxu1 %v353_v16 }
  0x27   : > { %920 = vmatpush.msra.mxu2 %v353_v16  ;;  %921 = vmatpush.msra.mxu3 %v353_v16 }
  0x28   : > { %860 = vmatmul.msk.f32.gmra.mxu0 %vm297_vm0, %v287_v17  ;;  %379 = vmatpush.msra.mxu1 %v352_v18 }
  0x29   : > { %922 = vmatpush.msra.mxu2 %v352_v18  ;;  %923 = vmatpush.msra.mxu3 %v352_v18 }
  0x2a   : > { %380 = vmatpush.msra.mxu1 %v351_v19 }
  0x2b   : > { %924 = vmatpush.msra.mxu2 %v351_v19  ;;  %925 = vmatpush.msra.mxu3 %v351_v19 }
  0x2c   : > { %381 = vmatpush.msra.mxu1 %v350_v21 }
  0x2d   : > { %926 = vmatpush.msra.mxu2 %v350_v21  ;;  %927 = vmatpush.msra.mxu3 %v350_v21 }
  0x2e   : > { %382 = vmatpush.msra.mxu1 %v349_v22 }
  0x2f   : > { %928 = vmatpush.msra.mxu2 %v349_v22  ;;  %929 = vmatpush.msra.mxu3 %v349_v22 }
  0x30   : > { %861 = vmatmul.msk.f32.gmra.mxu0 %vm297_vm0, %v288_v20  ;;  %383 = vmatpush.msra.mxu1 %v348_v23 }
  0x31   : > { %930 = vmatpush.msra.mxu2 %v348_v23  ;;  %931 = vmatpush.msra.mxu3 %v348_v23 }
  0x95   : > { %v327_v25 = vpop.f32.mrf.mxu0 }
  0x96   : > { %v328_v26 = vadd.f32 %v1084_v24, %v327_v25 }
  0x98   : > { %v339_v27 = vmax.f32 %v328_v26, 0.0 }
  0x9a   : > { %344 = vst.msk [vmem:[%s1395_s26] sm:$0xff] %vm343_vm1, %v339_v27  ;;  %384 = vmatmul.f32.vlgmr.msra.gmra.mxu1 %v339_v27 }
  0x9d   : > { %v330_v28 = vpop.f32.mrf.mxu0 }
  0x9e   : > { %v331_v29 = vadd.f32 %v1084_v24, %v330_v28 }
  0xa0   : > { %v340_v30 = vmax.f32 %v331_v29, 0.0 }
  0xa2   : > { %345 = vst.msk [vmem:[%s1395_s26 + $0x8] sm:$0xff] %vm343_vm1, %v340_v30  ;;  %387 = vmatmul.f32.vlgmr.msra.gmra.mxu2 %v340_v30 }
  0xa5   : > { %v333_v31 = vpop.f32.mrf.mxu0 }
  0xa6   : > { %v334_v32 = vadd.f32 %v1084_v24, %v333_v31 }
  0xa8   : > { %v341_v33 = vmax.f32 %v334_v32, 0.0 }
  0xaa   : > { %346 = vst.msk [vmem:[%s1395_s26 + $0x10] sm:$0xff] %vm343_vm1, %v341_v33  ;;  %390 = vmatmul.f32.vlgmr.msra.gmra.mxu3 %v341_v33 }
  0xad   : > { %v336_v34 = vpop.f32.mrf.mxu0 }
  0xae   : > { %v337_v35 = vadd.f32 %v1084_v24, %v336_v34 }
  0xb0   : > { %v342_v36 = vmax.f32 %v337_v35, 0.0 }
  0xb2   : > { %347 = vst.msk [vmem:[%s1395_s26 + $0x18] sm:$0xff] %vm343_vm1, %v342_v36  ;;  %393 = vmatmul.f32.gmra.mxu3 %v342_v36 }
 0x117   : > { %v385_v38 = vpop.f32.mrf.mxu1 }
 0x118   : > { %v386_v39 = vadd.f32 %v1085_v37, %v385_v38 }
 0x11a   : > { %v397_v40 = vmul.f32 0.5, %v386_v39 }
 0x11c   : > { %1086 = vtanh.f32 %v397_v40 }
 0x122   : > { %v1087_v41 = vpop.eup %1086 }
 0x123   : > { %v405_v42 = vadd.f32 1.0, %v1087_v41 }
 0x125   : > { %v409_v43 = vmul.f32 0.5, %v405_v42  ;;  %v388_v44 = vpop.f32.mrf.mxu2 }
 0x126   : > { %v389_v45 = vadd.f32 %v1085_v37, %v388_v44 }
 0x127   : > { %413 = vst.msk [vmem:[%s1409_s30] sm:$0xff] %vm297_vm0, %v409_v43 }
 0x128   : > { %v398_v46 = vmul.f32 0.5, %v389_v45 }
 0x12a   : > { %1088 = vtanh.f32 %v398_v46 }
 0x12d   : > { %v391_v47 = vpop.f32.mrf.mxu3 }
 0x12e   : > { %v392_v48 = vadd.f32 %v1085_v37, %v391_v47 }
 0x130   : > { %v1089_v49 = vpop.eup %1088  ;;  %v399_v50 = vmul.f32 0.5, %v392_v48 }
 0x131   : > { %v406_v51 = vadd.f32 1.0, %v1089_v49 }
 0x132   : > { %1090 = vtanh.f32 %v399_v50 }
 0x133   : > { %v410_v52 = vmul.f32 0.5, %v406_v51 }
 0x135   : > { %414 = vst.msk [vmem:[%s1409_s30 + $0x8] sm:$0xff] %vm297_vm0, %v410_v52  ;;  %v394_v53 = vpop.f32.mrf.mxu3 }
 0x136   : > { %v395_v54 = vadd.f32 %v1085_v37, %v394_v53 }
 0x138   : > { %v1091_v55 = vpop.eup %1090  ;;  %v400_v56 = vmul.f32 0.5, %v395_v54 }
 0x139   : > { %v407_v57 = vadd.f32 1.0, %v1091_v55 }
 0x13a   : > { %1092 = vtanh.f32 %v400_v56 }
 0x13b   : > { %v411_v58 = vmul.f32 0.5, %v407_v57 }
 0x13d   : > { %415 = vst.msk [vmem:[%s1409_s30 + $0x10] sm:$0xff] %vm297_vm0, %v411_v58 }
 0x140   : > { %v1093_v59 = vpop.eup %1092 }
 0x141   : > { %v408_v60 = vadd.f32 1.0, %v1093_v59  ;;  %427 = sbr.rel (!%p1306_p4) target bundleno = 365 (0x16d), region = 44 }
 0x143   : > { %v412_v61 = vmul.f32 0.5, %v408_v60 }
 0x145   : > { %416 = vst.msk [vmem:[%s1409_s30 + $0x18] sm:$0xff] %vm297_vm0, %v412_v61 }
 0x146   : > { %s1539_s7 = smov (!%p430_p8, %s429_s7), 4 }
 0x147   : > { %s865_s14 = sshll.u32 %s1539_s7, 3 }
 0x148   : > { %p868_p9 = scmp.eq.s32.totalorder %s865_s14, 0 }
 0x149   : > { %s1432_s15 = sshrl.u32 (!%p868_p9), %s1539_s7, 2 }
 0x14a   : > { %438 = sbr.rel (%p868_p9) target bundleno = 365 (0x16d), region = 48  ;;  %p869_p10 = scmp.le.s32.totalorder (!%p868_p9), %s1432_s15, 0 }
 0x14f   : > { %769 = sbr.rel (%p869_p10) target bundleno = 348 (0x15c), region = 196  ;;  %s1529_s16 = smov (!%p869_p10), %s1426_s13 }
 0x150   : > { %s1530_s17 = smov (!%p869_p10), %s1395_s26  ;;  %s1441_s18 = smov (!%p869_p10), 0  }
 0x151   : > { %s1194_s9 = smov (!%p869_p10), 0  }
 0x154 LB: >> { %v507_v62 = vld [vmem:[%s1188_s17] sm:$0xff]  ;;  %v509_v63 = vld [vmem:[%s1188_s17 + $0x8] sm:$0xff]  ;;  %v511_v0 = vld [vmem:[%s1188_s17 + $0x10] sm:$0xff]  ;;  %s515_s19 = sadd.s32 1, %s1192_s18  ;;  %s501_s9 = sadd.s32 1, %s1196_s9   ;;  %s1196_s9 = sphi %s1194_s9, %s501_s9   ;;  %s1192_s18 = sphi %s1441_s18, %s1531_s18   ;;  %s1188_s17 = sphi %s1530_s17, %s520_s17   ;;  %s1184_s16 = sphi %s1529_s16, %s521_s16  }
 0x155   : >> { %508 = vst [vmem:[%s1184_s16] sm:$0xff] %v507_v62  ;;  %v513_v1 = vld [vmem:[%s1188_s17 + $0x18] sm:$0xff]  ;;  %p516_p11 = scmp.ge.s32.totalorder %s515_s19, %s1432_s15  ;;  %p500_p12 = scmp.ge.s32.totalorder %s501_s9, %s1432_s15 }
 0x156   : >> { %510 = vst [vmem:[%s1184_s16 + $0x8] sm:$0xff] %v509_v63 }
 0x157   : >> { %512 = vst [vmem:[%s1184_s16 + $0x10] sm:$0xff] %v511_v0  ;;  %s1541_s19 = smov (%p516_p11, %s515_s19), 0  ;;  %503 = sbr.rel (!%p500_p12) target bundleno = 340 (0x154), region = 202 }
 0x158   : >> { %514 = vst [vmem:[%s1184_s16 + $0x18] sm:$0xff] %v513_v1  ;;  %s870_s20 = sshll.u32 %s1541_s19, 5  ;;  %s1531_s18 = smov %s1541_s19 }
 0x159   : >> { %s520_s17 = scalar_lea.vmem %s1395_s26, %s870_s20 [#allocation2]   ;;  %s521_s16 = scalar_lea.vmem %s1426_s13, %s870_s20  }
 0x15c PF: > { %s1457_s23 = sand.u32 3, %s1539_s7   ;;  %s895_s21 = sshll.u32 %s1432_s15, 5 }
 0x15d   : > { %s526_s27 = scalar_lea.vmem %s1395_s26, %s895_s21 [#allocation2]   ;;  %s528_s8 = scalar_lea.vmem %s1426_s13, %s895_s21  }
 0x15e   : > { %p875_p13 = scmp.le.s32.totalorder %s1457_s23, 0 }
 0x15f   : > { %s1198_s11 = smov (!%p875_p13), %s528_s8   ;;  %s1202_s12 = smov (!%p875_p13), %s526_s27  }
 0x160   : > { %783 = sbr.rel (%p875_p13) target bundleno = 365 (0x16d), region = 207  ;;  %s1206_s14 = smov (!%p875_p13), 0  }
 0x161   : > { %s1210_s18 = smov (!%p875_p13), 0  }
 0x165 LB: >> { %v538_v2 = vld [vmem:[%s1204_s12] sm:$0xff]  ;;  %s540_s7 = sadd.s32 1, %s1208_s14  ;;  %s532_s18 = sadd.s32 1, %s1212_s18   ;;  %s1212_s18 = sphi %s1210_s18, %s532_s18   ;;  %s1208_s14 = sphi %s1206_s14, %s1207_s14   ;;  %s1204_s12 = sphi %s1202_s12, %s545_s12   ;;  %s1200_s11 = sphi %s1198_s11, %s546_s11  }
 0x166   : >> { %539 = vst [vmem:[%s1200_s11] sm:$0xff] %v538_v2  ;;  %p541_p0 = scmp.ge.s32.totalorder %s540_s7, %s1457_s23  ;;  %p531_p1 = scmp.ge.s32.totalorder %s532_s18, %s1457_s23 }
 0x168   : >> { %s1543_s7 = smov (%p541_p0, %s540_s7), 0  ;;  %534 = sbr.rel (!%p531_p1) target bundleno = 357 (0x165), region = 213 }
 0x169   : >> { %s876_s26 = sshll.u32 %s1543_s7, 3  ;;  %s1207_s14 = smov %s1543_s7  }
 0x16a   : >> { %s545_s12 = scalar_lea.vmem %s526_s27, %s876_s26 [#allocation2]   ;;  %s546_s11 = scalar_lea.vmem %s528_s8, %s876_s26  }
 0x16d PF: > { %552 = sbr.rel (!%p1306_p4) target bundleno = 409 (0x199), region = 96  ;;  %s554_s13 = ssub.s32 (%p1306_p4), 7, %s1317_s10 }
 0x16e   : > { %s897_s15 = sshll.u32 (%p1306_p4), %s1294_s24, 5  ;;  %p555_p2 = scmp.lt.s32.totalorder (%p1306_p4), %s554_s13, 4 }
 0x16f   : > { %s1472_s9 = scalar_lea.vmem (%p1306_p4), %s1527_s6, %s897_s15  }
 0x172   : > { %s1545_s13 = smov (!%p555_p2, %s554_s13), 4 }
 0x173   : > { %s879_s19 = sshll.u32 %s1545_s13, 3 }
 0x174   : > { %p882_p3 = scmp.eq.s32.totalorder %s879_s19, 0 }
 0x175   : > { %s1478_s20 = sshrl.u32 (!%p882_p3), %s1545_s13, 2 }
 0x176   : > { %563 = sbr.rel (%p882_p3) target bundleno = 409 (0x199), region = 100  ;;  %p883_p4 = scmp.le.s32.totalorder (!%p882_p3), %s1478_s20, 0 }
 0x17b   : > { %797 = sbr.rel (%p883_p4) target bundleno = 392 (0x188), region = 218  ;;  %s1532_s24 = smov (!%p883_p4), %s1472_s9 }
 0x17c   : > { %s1533_s29 = smov (!%p883_p4), %s1409_s30  ;;  %s1487_s10 = smov (!%p883_p4), 0  }
 0x17d   : > { %s1226_s23 = smov (!%p883_p4), 0  }
 0x180 LB: >> { %v632_v3 = vld [vmem:[%s1220_s29] sm:$0xff]  ;;  %v634_v4 = vld [vmem:[%s1220_s29 + $0x8] sm:$0xff]  ;;  %v636_v5 = vld [vmem:[%s1220_s29 + $0x10] sm:$0xff]  ;;  %s640_s21 = sadd.s32 1, %s1224_s10  ;;  %s626_s23 = sadd.s32 1, %s1228_s23   ;;  %s1228_s23 = sphi %s1226_s23, %s626_s23   ;;  %s1224_s10 = sphi %s1487_s10, %s1534_s10   ;;  %s1220_s29 = sphi %s1533_s29, %s645_s29   ;;  %s1216_s24 = sphi %s1532_s24, %s646_s24  }
 0x181   : >> { %633 = vst [vmem:[%s1216_s24] sm:$0xff] %v632_v3  ;;  %v638_v6 = vld [vmem:[%s1220_s29 + $0x18] sm:$0xff]  ;;  %p641_p5 = scmp.ge.s32.totalorder %s640_s21, %s1478_s20  ;;  %p625_p6 = scmp.ge.s32.totalorder %s626_s23, %s1478_s20 }
 0x182   : >> { %635 = vst [vmem:[%s1216_s24 + $0x8] sm:$0xff] %v634_v4 }
 0x183   : >> { %637 = vst [vmem:[%s1216_s24 + $0x10] sm:$0xff] %v636_v5  ;;  %s1547_s21 = smov (%p641_p5, %s640_s21), 0  ;;  %628 = sbr.rel (!%p625_p6) target bundleno = 384 (0x180), region = 224 }
 0x184   : >> { %639 = vst [vmem:[%s1216_s24 + $0x18] sm:$0xff] %v638_v6  ;;  %s884_s27 = sshll.u32 %s1547_s21, 5  ;;  %s1534_s10 = smov %s1547_s21 }
 0x185   : >> { %s645_s29 = scalar_lea.vmem %s1409_s30, %s884_s27 [#allocation3]   ;;  %s646_s24 = scalar_lea.vmem %s1472_s9, %s884_s27  }
 0x188 PF: > { %s1503_s8 = sand.u32 3, %s1545_s13   ;;  %s898_s11 = sshll.u32 %s1478_s20, 5 }
 0x189   : > { %s651_s12 = scalar_lea.vmem %s1409_s30, %s898_s11 [#allocation3]   ;;  %s653_s14 = scalar_lea.vmem %s1472_s9, %s898_s11  }
 0x18a   : > { %p889_p7 = scmp.le.s32.totalorder %s1503_s8, 0 }
 0x18b   : > { %s1230_s18 = smov (!%p889_p7), %s653_s14   ;;  %s1234_s7 = smov (!%p889_p7), %s651_s12  }
 0x18c   : > { %811 = sbr.rel (%p889_p7) target bundleno = 409 (0x199), region = 229  ;;  %s1238_s26 = smov (!%p889_p7), 0  }
 0x18d   : > { %s1242_s15 = smov (!%p889_p7), 0  }
 0x191 LB: >> { %v663_v7 = vld [vmem:[%s1236_s7] sm:$0xff]  ;;  %s665_s13 = sadd.s32 1, %s1240_s26  ;;  %s657_s15 = sadd.s32 1, %s1244_s15   ;;  %s1244_s15 = sphi %s1242_s15, %s657_s15   ;;  %s1240_s26 = sphi %s1238_s26, %s1239_s26   ;;  %s1236_s7 = sphi %s1234_s7, %s670_s7   ;;  %s1232_s18 = sphi %s1230_s18, %s671_s18  }
 0x192   : >> { %664 = vst [vmem:[%s1232_s18] sm:$0xff] %v663_v7  ;;  %p666_p8 = scmp.ge.s32.totalorder %s665_s13, %s1503_s8  ;;  %p656_p9 = scmp.ge.s32.totalorder %s657_s15, %s1503_s8 }
 0x194   : >> { %s1549_s13 = smov (%p666_p8, %s665_s13), 0  ;;  %659 = sbr.rel (!%p656_p9) target bundleno = 401 (0x191), region = 235 }
 0x195   : >> { %s890_s30 = sshll.u32 %s1549_s13, 3  ;;  %s1239_s26 = smov %s1549_s13  }
 0x196   : >> { %s670_s7 = scalar_lea.vmem %s651_s12, %s890_s30 [#allocation3]   ;;  %s671_s18 = scalar_lea.vmem %s653_s14, %s890_s30  }
 0x199 PF: > { %p14_p10 = scmp.ge.s32.totalorder %s1296_s25, 4   ;;  %s1535_s21 = smov %s1176_s22 }
 0x19a   : > { %s1536_s22 = smov %s1304_s28  ;;  %s1537_s23 = smov %s1296_s25 }
 0x19b   :  { %16 = sbr.rel (!%p14_p10) target bundleno = 2 (0x2), region = 246 }

</bundles_post_ra>
